<compile_context>
chip_gen: v7x
topology: tpu7x:2x2x1
jax: 0.10.0
libtpu: 0.0.40
codegen_flags: <defaults>
</compile_context>

<pallas_src>
import numpy as np
import jax
import jax.numpy as jnp
from jax.experimental import pallas as pl
from jax.experimental.pallas import tpu as pltpu


# ------------- filter / weight construction (host-side, cached) -------------

def _make_morlet_filter(sigma, size, imaginary=False):
    # Mirrors WaveletLayer._make_morlet_filter.  `-size // 2` == (-size)//2.
    t = np.linspace((-size) // 2, size // 2, size)
    y, x = np.meshgrid(t, t, indexing="ij")
    r = np.sqrt(x ** 2 + y ** 2)
    if imaginary:
        re = np.zeros((size, size))
    else:
        re = (np.exp(-r ** 2 / (2 * sigma ** 2))
              * np.cos(2 * np.pi * r / sigma - np.pi) * np.sqrt(np.pi) / sigma)
    # TODO(synk): the reference casts the complex kernel (re + 1j*im) to
    # float32, which silently discards the imaginary component; only the real
    # Morlet part survives, so the imaginary=True path is dead.
    return re.astype(np.float32)


def _pad_or_crop(k, H, W):
    # rfft2(kernel, s=(H, W)) semantics: zero-pad or trim to (H, W), top-left.
    out = np.zeros((H, W), np.float32)
    h, w = min(H, k.shape[0]), min(W, k.shape[1])
    out[:h, :w] = k[:h, :w]
    return out


def _circulant_matrix(k):
    # M[p*W+q, i*W+j] = k[(i-p) % H, (j-q) % W]
    # so (x_flat @ M) == irfft2(rfft2(x) * rfft2(k, s=(H,W)), s=(H,W)) exactly.
    H, W = k.shape
    di = (np.arange(H)[None, :] - np.arange(H)[:, None]) % H      # (p, i)
    dj = (np.arange(W)[None, :] - np.arange(W)[:, None]) % W      # (q, j)
    M = k[di[:, None, :, None], dj[None, :, None, :]]             # (p, q, i, j)
    return np.ascontiguousarray(M.reshape(H * W, H * W)).astype(np.float32)


def _fold_avg_pool(M, H, W):
    # MP = M @ P with P the F.avg_pool2d(k=2, s=2) operator, built by pooling
    # M's output-pixel axis directly (never materialises the dense P).
    # Odd trailing rows/cols are dropped, matching avg_pool2d floor behavior.
    Ho, Wo = H // 2, W // 2
    M3 = M.reshape(H * W, H, W)[:, :2 * Ho, :2 * Wo]
    MP = M3.reshape(H * W, Ho, 2, Wo, 2).mean(axis=(2, 4))
    return np.ascontiguousarray(MP.reshape(H * W, Ho * Wo)).astype(np.float32)


# ------------------------------ tiling helpers --------------------------------

def _pick_tile(dim, max_tile, align):
    # Largest `align`-aligned tile <= max_tile that divides `dim`; otherwise
    # fall back to the full extent (always a legal block shape).
    for cand in range(min(dim, max_tile), 0, -1):
        if cand % align == 0 and dim % cand == 0:
            return cand
    return dim


# ------------------- fused conv + pool kernel (one call / scale) --------------

def _fused_conv_pool(x, M, MP, split, out_dtype=jnp.float32):
    """conv = x @ M (all rows) and pool = x @ MP (pool MXU work only for row
    tiles overlapping rows >= split) in a single pallas_call with two outputs.
    Returns (conv, pool_all) or None when the joint tiling constraints fail."""
    R, K = x.shape
    Km, N = M.shape
    Kp, Np = MP.shape
    assert K == Km == Kp
    if N <= 512:
        tn, tnp = N, Np            # single N tile; pool tile = full extent
    elif N % 512 == 0 and 4 * Np == N:
        tn, tnp = 512, 128         # pool columns tile in lockstep with conv
    else:
        return None                # caller falls back to two separate matmuls
    tm = _pick_tile(R, 256, 8)     # rows: C*B (small) or 8-aligned tiles
    tk = _pick_tile(K, 512, 128)   # contraction tiles, 128-aligned
    grid = (R // tm, N // tn, K // tk)

    def kernel(x_ref, m_ref, mp_ref, conv_ref, pool_ref, acc_c, acc_p):
        k = pl.program_id(2)

        @pl.when(k == 0)
        def _():
            acc_c[...] = jnp.zeros_like(acc_c)
            acc_p[...] = jnp.zeros_like(acc_p)

        xb = x_ref[...]                       # one load feeds both MXU dots
        acc_c[...] += jnp.dot(xb, m_ref[...],
                              preferred_element_type=jnp.float32)

        # Only the low-pass rows (>= split) are pooled by the reference; skip
        # the pool dot for row tiles that are entirely high-pass.
        @pl.when((pl.program_id(0) + 1) * tm > split)
        def _():
            acc_p[...] += jnp.dot(xb, mp_ref[...],
                                  preferred_element_type=jnp.float32)

        @pl.when(k == pl.num_programs(2) - 1)
        def _():
            conv_ref[...] = acc_c[...].astype(conv_ref.dtype)
            pool_ref[...] = acc_p[...].astype(pool_ref.dtype)

    return pl.pallas_call(
        kernel,
        out_shape=(jax.ShapeDtypeStruct((R, N), out_dtype),
                   jax.ShapeDtypeStruct((R, Np), out_dtype)),
        grid_spec=pltpu.PrefetchScalarGridSpec(
            num_scalar_prefetch=0,
            grid=grid,
            in_specs=[
                pl.BlockSpec((tm, tk), lambda i, j, k: (i, k)),
                pl.BlockSpec((tk, tn), lambda i, j, k: (k, j)),
                pl.BlockSpec((tk, tnp), lambda i, j, k: (k, j)),
            ],
            out_specs=[
                pl.BlockSpec((tm, tn), lambda i, j, k: (i, j)),
                pl.BlockSpec((tm, tnp), lambda i, j, k: (i, j)),
            ],
            scratch_shapes=[pltpu.VMEM((tm, tn), jnp.float32),
                            pltpu.VMEM((tm, tnp), jnp.float32)],
        ),
        compiler_params=pltpu.CompilerParams(
            dimension_semantics=("parallel", "parallel", "arbitrary")),
    )(x, M, MP)


# --------------- fallback: plain tiled matmul (proven rev-2 path) -------------

def _matmul_kernel(x_ref, w_ref, o_ref, acc_ref):
    @pl.when(pl.program_id(2) == 0)
    def _():
        acc_ref[...] = jnp.zeros_like(acc_ref)

    acc_ref[...] += jnp.dot(x_ref[...], w_ref[...],
                            preferred_element_type=jnp.float32)

    @pl.when(pl.program_id(2) == pl.num_programs(2) - 1)
    def _():
        o_ref[...] = acc_ref[...].astype(o_ref.dtype)


def _tiled_matmul(x, w, out_dtype=jnp.float32):
    """(R, K) @ (K, N) -> (R, N) on the MXU with a (rows, N, K) grid."""
    R, K = x.shape
    Kw, N = w.shape
    assert K == Kw
    tm = _pick_tile(R, 256, 8)
    tk = _pick_tile(K, 512, 128)
    tn = _pick_tile(N, 512, 128)
    grid = (R // tm, N // tn, K // tk)
    return pl.pallas_call(
        _matmul_kernel,
        out_shape=jax.ShapeDtypeStruct((R, N), out_dtype),
        grid_spec=pltpu.PrefetchScalarGridSpec(
            num_scalar_prefetch=0,
            grid=grid,
            in_specs=[
                pl.BlockSpec((tm, tk), lambda i, j, k: (i, k)),
                pl.BlockSpec((tk, tn), lambda i, j, k: (k, j)),
            ],
            out_specs=pl.BlockSpec((tm, tn), lambda i, j, k: (i, j)),
            scratch_shapes=[pltpu.VMEM((tm, tn), jnp.float32)],
        ),
        compiler_params=pltpu.CompilerParams(
            dimension_semantics=("parallel", "parallel", "arbitrary")),
    )(x, w)


# --------------------------- jitted forward pass ------------------------------

@jax.jit
def _wavelet_forward(x, mats):
    B, C, H, W = x.shape
    # Channel-major flatten once; this layout is kept across scales so the
    # pooled output of scale i feeds scale i+1 with no intermediate transpose.
    x_flat = jnp.transpose(x, (1, 0, 2, 3)).reshape(C * B, H * W)
    coeffs = []
    for M, MP in mats:
        c_h = C // 2                  # high-pass channel count
        c_l = C - c_h                 # low-pass channel count
        split = c_h * B               # low-pass rows are the trailing block

        xw = x_flat.astype(M.dtype)   # bf16 (or f32) into the MXU, f32 accum

        # FFT circular conv == circulant matmul; avg_pool2d of the low-pass
        # conv is folded into MP.  Both run in ONE fused pallas_call when the
        # joint tiling constraints hold, otherwise two tiled matmuls.
        fused = _fused_conv_pool(xw, M, MP, split)
        if fused is not None:
            conv_flat, pooled_all = fused                  # (C*B, H*W), (C*B, Ho*Wo)
            pooled_flat = pooled_all[split:]               # keep low-pass rows
        else:
            conv_flat = _tiled_matmul(xw, M)               # (C*B, H*W) f32
            pooled_flat = _tiled_matmul(xw[split:], MP)    # (c_l*B, Ho*Wo)

        conv = jnp.transpose(conv_flat.reshape(C, B, H, W), (1, 0, 2, 3))
        coeffs.append(conv[:, :c_h])   # h
        coeffs.append(conv[:, c_h:])   # l

        H, W, C = H // 2, W // 2, c_l
        x_flat = pooled_flat           # already channel-major (C*B, H*W)

    final = jnp.transpose(x_flat.reshape(C, B, H, W), (1, 0, 2, 3))
    # TODO(synk): the reference's torch.cat(coeffs + [x], dim=1) cannot work
    # (per-scale coefficients have different spatial sizes, and its
    # expand_as / irfft2(s=tensor) calls raise in PyTorch); return the
    # multi-resolution pyramid as a tuple instead.
    return tuple(coeffs) + (final,)


# --------------------------------- wrapper ------------------------------------

class WaveletLayerPallas:
    def __init__(self, num_scales=3, scale_factor=2, wavelet="morlet",
                 freq=0.25, compute_dtype=jnp.bfloat16):
        if wavelet != "morlet":
            raise NotImplementedError("Unsupported wavelet type")
        self.num_scales = num_scales
        self.scale_factor = scale_factor
        self.freq = freq
        self.filter_size = 7
        self.sigma = 2 * np.pi / freq / (1 + np.sqrt(2))
        # bf16 weights use the v6e/v7x MXU natively and halve weight DMA/VMEM
        # (accumulation is always f32).  Pass compute_dtype=jnp.float32 for
        # exact parity with the f32 FFT reference.
        self.compute_dtype = compute_dtype
        self._mats_cache = {}   # (H, W) -> tuple of per-scale (M, MP) arrays

    def _get_mats(self, H, W):
        key = (H, W)
        if key not in self._mats_cache:
            mats = []
            h, w = H, W
            for i in range(self.num_scales):
                size = self.filter_size * self.scale_factor ** i
                sigma = self.sigma * self.scale_factor ** i
                k = _make_morlet_filter(sigma, size)     # real Morlet part
                k_eff = _pad_or_crop(k, h, w)            # rfft2(..., s=(h,w))
                M = _circulant_matrix(k_eff)             # (h*w, h*w)
                MP = _fold_avg_pool(M, h, w)             # (h*w, (h//2)*(w//2))
                mats.append((jnp.asarray(M, dtype=self.compute_dtype),
                             jnp.asarray(MP, dtype=self.compute_dtype)))
                h, w = h // 2, w // 2
            self._mats_cache[key] = tuple(mats)
        return self._mats_cache[key]

    def __call__(self, x):
        _, _, H, W = x.shape
        mats = self._get_mats(H, W)
        return _wavelet_forward(x, mats)


if __name__ == "__main__":
    key = jax.random.PRNGKey(0)
    x = jax.random.normal(key, (2, 4, 16, 16), dtype=jnp.float32)

    layer = WaveletLayerPallas(num_scales=3, scale_factor=2,
                               wavelet="morlet", freq=0.25)
    outs = layer(x)
    outs = jax.block_until_ready(outs)
    # second call exercises the cached-weights / compiled path
    outs = jax.block_until_ready(layer(x))
    print("KERNEL_OK")
</pallas_src>

<mosaic_0001>
module attributes {stable_mosaic.version = 11 : i64} {
  func.func @kernel(%arg0: i32, %arg1: i32, %arg2: i32, %arg3: memref<8x256xbf16, #tpu.memory_space<vmem>>, %arg4: memref<256x256xbf16, #tpu.memory_space<vmem>>, %arg5: memref<256x64xbf16, #tpu.memory_space<vmem>>, %arg6: memref<8x256xf32, #tpu.memory_space<vmem>>, %arg7: memref<8x64xf32, #tpu.memory_space<vmem>>, %arg8: memref<8x256xf32, #tpu.memory_space<vmem>>, %arg9: memref<8x64xf32, #tpu.memory_space<vmem>>) attributes {dimension_semantics = [#tpu.dimension_semantics<parallel>, #tpu.dimension_semantics<parallel>, #tpu.dimension_semantics<arbitrary>], iteration_bounds = array<i64: 1, 1, 1>, scalar_prefetch = 0 : i64, scratch_operands = 2 : i64, tpu.core_type = #tpu.core_type<tc>, window_params = [{transform_indices = @transform_0, window_bounds = array<i64: 8, 256>}, {transform_indices = @transform_1, window_bounds = array<i64: 256, 256>}, {transform_indices = @transform_2, window_bounds = array<i64: 256, 64>}, {transform_indices = @transform_3, window_bounds = array<i64: 8, 256>}, {transform_indices = @transform_4, window_bounds = array<i64: 8, 64>}]} {
    %c0_i32 = arith.constant 0 : i32
    %0 = arith.cmpi eq, %arg2, %c0_i32 : i32
    %1 = arith.extui %0 : i1 to i32
    %c0_i32_0 = arith.constant 0 : i32
    %2 = arith.cmpi ne, %1, %c0_i32_0 : i32
    scf.if %2 {
      %cst_11 = arith.constant 0.000000e+00 : f32
      %17 = vector.broadcast %cst_11 : f32 to vector<8x256xf32>
      %c0_12 = arith.constant 0 : index
      %c0_13 = arith.constant 0 : index
      %18 = vector.load %arg8[%c0_12, %c0_13] : memref<8x256xf32, #tpu.memory_space<vmem>>, vector<8x256xf32>
      tpu.vector_store %arg8[%c0_12, %c0_13], %17 {strides = array<i32>} : memref<8x256xf32, #tpu.memory_space<vmem>>, vector<8x256xf32>,
      %cst_14 = arith.constant 0.000000e+00 : f32
      %19 = vector.broadcast %cst_14 : f32 to vector<8x64xf32>
      %c0_15 = arith.constant 0 : index
      %c0_16 = arith.constant 0 : index
      %20 = vector.load %arg9[%c0_15, %c0_16] : memref<8x64xf32, #tpu.memory_space<vmem>>, vector<8x64xf32>
      tpu.vector_store %arg9[%c0_15, %c0_16], %19 {strides = array<i32>} : memref<8x64xf32, #tpu.memory_space<vmem>>, vector<8x64xf32>,
    } else {
    }
    %c0 = arith.constant 0 : index
    %c0_1 = arith.constant 0 : index
    %3 = vector.load %arg3[%c0, %c0_1] : memref<8x256xbf16, #tpu.memory_space<vmem>>, vector<8x256xbf16>
    %c0_2 = arith.constant 0 : index
    %c0_3 = arith.constant 0 : index
    %4 = vector.load %arg8[%c0_2, %c0_3] : memref<8x256xf32, #tpu.memory_space<vmem>>, vector<8x256xf32>
    %c0_4 = arith.constant 0 : index
    %c0_5 = arith.constant 0 : index
    %5 = vector.load %arg4[%c0_4, %c0_5] : memref<256x256xbf16, #tpu.memory_space<vmem>>, vector<256x256xbf16>
    %cst = arith.constant dense<0.000000e+00> : vector<8x256xf32>
    %6 = tpu.matmul %3, %5, %cst {dimension_numbers = #tpu.dot_dimension_numbers<[1], [0], [0], [1], [0, 0, 1, 1], [], []>} : vector<8x256xbf16>, vector<256x256xbf16>, vector<8x256xf32> -> vector<8x256xf32>
    %7 = arith.addf %4, %6 : vector<8x256xf32>
    %c0_6 = arith.constant 0 : index
    %c0_7 = arith.constant 0 : index
    %8 = vector.load %arg8[%c0_6, %c0_7] : memref<8x256xf32, #tpu.memory_space<vmem>>, vector<8x256xf32>
    tpu.vector_store %arg8[%c0_6, %c0_7], %7 {strides = array<i32>} : memref<8x256xf32, #tpu.memory_space<vmem>>, vector<8x256xf32>,
    %c1_i32 = arith.constant 1 : i32
    %9 = arith.addi %arg0, %c1_i32 : i32
    %c8_i32 = arith.constant 8 : i32
    %10 = arith.muli %9, %c8_i32 : i32
    %c4_i32 = arith.constant 4 : i32
    %11 = arith.cmpi sgt, %10, %c4_i32 : i32
    %12 = arith.extui %11 : i1 to i32
    %c0_i32_8 = arith.constant 0 : i32
    %13 = arith.cmpi ne, %12, %c0_i32_8 : i32
    scf.if %13 {
      %c0_11 = arith.constant 0 : index
      %c0_12 = arith.constant 0 : index
      %17 = vector.load %arg9[%c0_11, %c0_12] : memref<8x64xf32, #tpu.memory_space<vmem>>, vector<8x64xf32>
      %c0_13 = arith.constant 0 : index
      %c0_14 = arith.constant 0 : index
      %18 = vector.load %arg5[%c0_13, %c0_14] : memref<256x64xbf16, #tpu.memory_space<vmem>>, vector<256x64xbf16>
      %cst_15 = arith.constant dense<0.000000e+00> : vector<8x64xf32>
      %19 = tpu.matmul %3, %18, %cst_15 {dimension_numbers = #tpu.dot_dimension_numbers<[1], [0], [0], [1], [0, 0, 1, 1], [], []>} : vector<8x256xbf16>, vector<256x64xbf16>, vector<8x64xf32> -> vector<8x64xf32>
      %20 = arith.addf %17, %19 : vector<8x64xf32>
      %c0_16 = arith.constant 0 : index
      %c0_17 = arith.constant 0 : index
      %21 = vector.load %arg9[%c0_16, %c0_17] : memref<8x64xf32, #tpu.memory_space<vmem>>, vector<8x64xf32>
      tpu.vector_store %arg9[%c0_16, %c0_17], %20 {strides = array<i32>} : memref<8x64xf32, #tpu.memory_space<vmem>>, vector<8x64xf32>,
    } else {
    }
    %c0_i32_9 = arith.constant 0 : i32
    %14 = arith.cmpi eq, %arg2, %c0_i32_9 : i32
    %15 = arith.extui %14 : i1 to i32
    %c0_i32_10 = arith.constant 0 : i32
    %16 = arith.cmpi ne, %15, %c0_i32_10 : i32
    scf.if %16 {
      %c0_11 = arith.constant 0 : index
      %c0_12 = arith.constant 0 : index
      %17 = vector.load %arg8[%c0_11, %c0_12] : memref<8x256xf32, #tpu.memory_space<vmem>>, vector<8x256xf32>
      %c0_13 = arith.constant 0 : index
      %c0_14 = arith.constant 0 : index
      %18 = vector.load %arg6[%c0_13, %c0_14] : memref<8x256xf32, #tpu.memory_space<vmem>>, vector<8x256xf32>
      tpu.vector_store %arg6[%c0_13, %c0_14], %17 {strides = array<i32>} : memref<8x256xf32, #tpu.memory_space<vmem>>, vector<8x256xf32>,
      %c0_15 = arith.constant 0 : index
      %c0_16 = arith.constant 0 : index
      %19 = vector.load %arg9[%c0_15, %c0_16] : memref<8x64xf32, #tpu.memory_space<vmem>>, vector<8x64xf32>
      %c0_17 = arith.constant 0 : index
      %c0_18 = arith.constant 0 : index
      %20 = vector.load %arg7[%c0_17, %c0_18] : memref<8x64xf32, #tpu.memory_space<vmem>>, vector<8x64xf32>
      tpu.vector_store %arg7[%c0_17, %c0_18], %19 {strides = array<i32>} : memref<8x64xf32, #tpu.memory_space<vmem>>, vector<8x64xf32>,
    } else {
    }
    return
  }
  func.func @transform_0(%arg0: i32, %arg1: i32, %arg2: i32) -> (i32, i32) {
    %c0_i32 = arith.constant 0 : i32
    return %arg0, %arg2 : i32, i32
  }
  func.func @transform_1(%arg0: i32, %arg1: i32, %arg2: i32) -> (i32, i32) {
    %c0_i32 = arith.constant 0 : i32
    return %arg2, %arg1 : i32, i32
  }
  func.func @transform_2(%arg0: i32, %arg1: i32, %arg2: i32) -> (i32, i32) {
    %c0_i32 = arith.constant 0 : i32
    return %arg2, %arg1 : i32, i32
  }
  func.func @transform_3(%arg0: i32, %arg1: i32, %arg2: i32) -> (i32, i32) {
    %c0_i32 = arith.constant 0 : i32
    return %arg0, %arg1 : i32, i32
  }
  func.func @transform_4(%arg0: i32, %arg1: i32, %arg2: i32) -> (i32, i32) {
    %c0_i32 = arith.constant 0 : i32
    return %arg0, %arg1 : i32, i32
  }
}

module attributes {stable_mosaic.version = 11 : i64} {
  func.func @kernel(%arg0: i32, %arg1: i32, %arg2: i32, %arg3: memref<4x64xbf16, #tpu.memory_space<vmem>>, %arg4: memref<64x64xbf16, #tpu.memory_space<vmem>>, %arg5: memref<64x16xbf16, #tpu.memory_space<vmem>>, %arg6: memref<4x64xf32, #tpu.memory_space<vmem>>, %arg7: memref<4x16xf32, #tpu.memory_space<vmem>>, %arg8: memref<4x64xf32, #tpu.memory_space<vmem>>, %arg9: memref<4x16xf32, #tpu.memory_space<vmem>>) attributes {dimension_semantics = [#tpu.dimension_semantics<parallel>, #tpu.dimension_semantics<parallel>, #tpu.dimension_semantics<arbitrary>], iteration_bounds = array<i64: 1, 1, 1>, scalar_prefetch = 0 : i64, scratch_operands = 2 : i64, tpu.core_type = #tpu.core_type<tc>, window_params = [{transform_indices = @transform_0, window_bounds = array<i64: 4, 64>}, {transform_indices = @transform_1, window_bounds = array<i64: 64, 64>}, {transform_indices = @transform_2, window_bounds = array<i64: 64, 16>}, {transform_indices = @transform_3, window_bounds = array<i64: 4, 64>}, {transform_indices = @transform_4, window_bounds = array<i64: 4, 16>}]} {
    %c0_i32 = arith.constant 0 : i32
    %0 = arith.cmpi eq, %arg2, %c0_i32 : i32
    %1 = arith.extui %0 : i1 to i32
    %c0_i32_0 = arith.constant 0 : i32
    %2 = arith.cmpi ne, %1, %c0_i32_0 : i32
    scf.if %2 {
      %cst_11 = arith.constant 0.000000e+00 : f32
      %17 = vector.broadcast %cst_11 : f32 to vector<4x64xf32>
      %c0_12 = arith.constant 0 : index
      %c0_13 = arith.constant 0 : index
      %18 = vector.load %arg8[%c0_12, %c0_13] : memref<4x64xf32, #tpu.memory_space<vmem>>, vector<4x64xf32>
      tpu.vector_store %arg8[%c0_12, %c0_13], %17 {strides = array<i32>} : memref<4x64xf32, #tpu.memory_space<vmem>>, vector<4x64xf32>,
      %cst_14 = arith.constant 0.000000e+00 : f32
      %19 = vector.broadcast %cst_14 : f32 to vector<4x16xf32>
      %c0_15 = arith.constant 0 : index
      %c0_16 = arith.constant 0 : index
      %20 = vector.load %arg9[%c0_15, %c0_16] : memref<4x16xf32, #tpu.memory_space<vmem>>, vector<4x16xf32>
      tpu.vector_store %arg9[%c0_15, %c0_16], %19 {strides = array<i32>} : memref<4x16xf32, #tpu.memory_space<vmem>>, vector<4x16xf32>,
    } else {
    }
    %c0 = arith.constant 0 : index
    %c0_1 = arith.constant 0 : index
    %3 = vector.load %arg3[%c0, %c0_1] : memref<4x64xbf16, #tpu.memory_space<vmem>>, vector<4x64xbf16>
    %c0_2 = arith.constant 0 : index
    %c0_3 = arith.constant 0 : index
    %4 = vector.load %arg8[%c0_2, %c0_3] : memref<4x64xf32, #tpu.memory_space<vmem>>, vector<4x64xf32>
    %c0_4 = arith.constant 0 : index
    %c0_5 = arith.constant 0 : index
    %5 = vector.load %arg4[%c0_4, %c0_5] : memref<64x64xbf16, #tpu.memory_space<vmem>>, vector<64x64xbf16>
    %cst = arith.constant dense<0.000000e+00> : vector<4x64xf32>
    %6 = tpu.matmul %3, %5, %cst {dimension_numbers = #tpu.dot_dimension_numbers<[1], [0], [0], [1], [0, 0, 1, 1], [], []>} : vector<4x64xbf16>, vector<64x64xbf16>, vector<4x64xf32> -> vector<4x64xf32>
    %7 = arith.addf %4, %6 : vector<4x64xf32>
    %c0_6 = arith.constant 0 : index
    %c0_7 = arith.constant 0 : index
    %8 = vector.load %arg8[%c0_6, %c0_7] : memref<4x64xf32, #tpu.memory_space<vmem>>, vector<4x64xf32>
    tpu.vector_store %arg8[%c0_6, %c0_7], %7 {strides = array<i32>} : memref<4x64xf32, #tpu.memory_space<vmem>>, vector<4x64xf32>,
    %c1_i32 = arith.constant 1 : i32
    %9 = arith.addi %arg0, %c1_i32 : i32
    %c4_i32 = arith.constant 4 : i32
    %10 = arith.muli %9, %c4_i32 : i32
    %c2_i32 = arith.constant 2 : i32
    %11 = arith.cmpi sgt, %10, %c2_i32 : i32
    %12 = arith.extui %11 : i1 to i32
    %c0_i32_8 = arith.constant 0 : i32
    %13 = arith.cmpi ne, %12, %c0_i32_8 : i32
    scf.if %13 {
      %c0_11 = arith.constant 0 : index
      %c0_12 = arith.constant 0 : index
      %17 = vector.load %arg9[%c0_11, %c0_12] : memref<4x16xf32, #tpu.memory_space<vmem>>, vector<4x16xf32>
      %c0_13 = arith.constant 0 : index
      %c0_14 = arith.constant 0 : index
      %18 = vector.load %arg5[%c0_13, %c0_14] : memref<64x16xbf16, #tpu.memory_space<vmem>>, vector<64x16xbf16>
      %cst_15 = arith.constant dense<0.000000e+00> : vector<4x16xf32>
      %19 = tpu.matmul %3, %18, %cst_15 {dimension_numbers = #tpu.dot_dimension_numbers<[1], [0], [0], [1], [0, 0, 1, 1], [], []>} : vector<4x64xbf16>, vector<64x16xbf16>, vector<4x16xf32> -> vector<4x16xf32>
      %20 = arith.addf %17, %19 : vector<4x16xf32>
      %c0_16 = arith.constant 0 : index
      %c0_17 = arith.constant 0 : index
      %21 = vector.load %arg9[%c0_16, %c0_17] : memref<4x16xf32, #tpu.memory_space<vmem>>, vector<4x16xf32>
      tpu.vector_store %arg9[%c0_16, %c0_17], %20 {strides = array<i32>} : memref<4x16xf32, #tpu.memory_space<vmem>>, vector<4x16xf32>,
    } else {
    }
    %c0_i32_9 = arith.constant 0 : i32
    %14 = arith.cmpi eq, %arg2, %c0_i32_9 : i32
    %15 = arith.extui %14 : i1 to i32
    %c0_i32_10 = arith.constant 0 : i32
    %16 = arith.cmpi ne, %15, %c0_i32_10 : i32
    scf.if %16 {
      %c0_11 = arith.constant 0 : index
      %c0_12 = arith.constant 0 : index
      %17 = vector.load %arg8[%c0_11, %c0_12] : memref<4x64xf32, #tpu.memory_space<vmem>>, vector<4x64xf32>
      %c0_13 = arith.constant 0 : index
      %c0_14 = arith.constant 0 : index
      %18 = vector.load %arg6[%c0_13, %c0_14] : memref<4x64xf32, #tpu.memory_space<vmem>>, vector<4x64xf32>
      tpu.vector_store %arg6[%c0_13, %c0_14], %17 {strides = array<i32>} : memref<4x64xf32, #tpu.memory_space<vmem>>, vector<4x64xf32>,
      %c0_15 = arith.constant 0 : index
      %c0_16 = arith.constant 0 : index
      %19 = vector.load %arg9[%c0_15, %c0_16] : memref<4x16xf32, #tpu.memory_space<vmem>>, vector<4x16xf32>
      %c0_17 = arith.constant 0 : index
      %c0_18 = arith.constant 0 : index
      %20 = vector.load %arg7[%c0_17, %c0_18] : memref<4x16xf32, #tpu.memory_space<vmem>>, vector<4x16xf32>
      tpu.vector_store %arg7[%c0_17, %c0_18], %19 {strides = array<i32>} : memref<4x16xf32, #tpu.memory_space<vmem>>, vector<4x16xf32>,
    } else {
    }
    return
  }
  func.func @transform_0(%arg0: i32, %arg1: i32, %arg2: i32) -> (i32, i32) {
    %c0_i32 = arith.constant 0 : i32
    return %arg0, %arg2 : i32, i32
  }
  func.func @transform_1(%arg0: i32, %arg1: i32, %arg2: i32) -> (i32, i32) {
    %c0_i32 = arith.constant 0 : i32
    return %arg2, %arg1 : i32, i32
  }
  func.func @transform_2(%arg0: i32, %arg1: i32, %arg2: i32) -> (i32, i32) {
    %c0_i32 = arith.constant 0 : i32
    return %arg2, %arg1 : i32, i32
  }
  func.func @transform_3(%arg0: i32, %arg1: i32, %arg2: i32) -> (i32, i32) {
    %c0_i32 = arith.constant 0 : i32
    return %arg0, %arg1 : i32, i32
  }
  func.func @transform_4(%arg0: i32, %arg1: i32, %arg2: i32) -> (i32, i32) {
    %c0_i32 = arith.constant 0 : i32
    return %arg0, %arg1 : i32, i32
  }
}

module attributes {stable_mosaic.version = 11 : i64} {
  func.func @kernel(%arg0: i32, %arg1: i32, %arg2: i32, %arg3: memref<2x16xbf16, #tpu.memory_space<vmem>>, %arg4: memref<16x16xbf16, #tpu.memory_space<vmem>>, %arg5: memref<16x4xbf16, #tpu.memory_space<vmem>>, %arg6: memref<2x16xf32, #tpu.memory_space<vmem>>, %arg7: memref<2x4xf32, #tpu.memory_space<vmem>>, %arg8: memref<2x16xf32, #tpu.memory_space<vmem>>, %arg9: memref<2x4xf32, #tpu.memory_space<vmem>>) attributes {dimension_semantics = [#tpu.dimension_semantics<parallel>, #tpu.dimension_semantics<parallel>, #tpu.dimension_semantics<arbitrary>], iteration_bounds = array<i64: 1, 1, 1>, scalar_prefetch = 0 : i64, scratch_operands = 2 : i64, tpu.core_type = #tpu.core_type<tc>, window_params = [{transform_indices = @transform_0, window_bounds = array<i64: 2, 16>}, {transform_indices = @transform_1, window_bounds = array<i64: 16, 16>}, {transform_indices = @transform_2, window_bounds = array<i64: 16, 4>}, {transform_indices = @transform_3, window_bounds = array<i64: 2, 16>}, {transform_indices = @transform_4, window_bounds = array<i64: 2, 4>}]} {
    %c0_i32 = arith.constant 0 : i32
    %0 = arith.cmpi eq, %arg2, %c0_i32 : i32
    %1 = arith.extui %0 : i1 to i32
    %c0_i32_0 = arith.constant 0 : i32
    %2 = arith.cmpi ne, %1, %c0_i32_0 : i32
    scf.if %2 {
      %cst_12 = arith.constant 0.000000e+00 : f32
      %17 = vector.broadcast %cst_12 : f32 to vector<2x16xf32>
      %c0_13 = arith.constant 0 : index
      %c0_14 = arith.constant 0 : index
      %18 = vector.load %arg8[%c0_13, %c0_14] : memref<2x16xf32, #tpu.memory_space<vmem>>, vector<2x16xf32>
      tpu.vector_store %arg8[%c0_13, %c0_14], %17 {strides = array<i32>} : memref<2x16xf32, #tpu.memory_space<vmem>>, vector<2x16xf32>,
      %cst_15 = arith.constant 0.000000e+00 : f32
      %19 = vector.broadcast %cst_15 : f32 to vector<2x4xf32>
      %c0_16 = arith.constant 0 : index
      %c0_17 = arith.constant 0 : index
      %20 = vector.load %arg9[%c0_16, %c0_17] : memref<2x4xf32, #tpu.memory_space<vmem>>, vector<2x4xf32>
      tpu.vector_store %arg9[%c0_16, %c0_17], %19 {strides = array<i32>} : memref<2x4xf32, #tpu.memory_space<vmem>>, vector<2x4xf32>,
    } else {
    }
    %c0 = arith.constant 0 : index
    %c0_1 = arith.constant 0 : index
    %3 = vector.load %arg3[%c0, %c0_1] : memref<2x16xbf16, #tpu.memory_space<vmem>>, vector<2x16xbf16>
    %c0_2 = arith.constant 0 : index
    %c0_3 = arith.constant 0 : index
    %4 = vector.load %arg8[%c0_2, %c0_3] : memref<2x16xf32, #tpu.memory_space<vmem>>, vector<2x16xf32>
    %c0_4 = arith.constant 0 : index
    %c0_5 = arith.constant 0 : index
    %5 = vector.load %arg4[%c0_4, %c0_5] : memref<16x16xbf16, #tpu.memory_space<vmem>>, vector<16x16xbf16>
    %cst = arith.constant dense<0.000000e+00> : vector<2x16xf32>
    %6 = tpu.matmul %3, %5, %cst {dimension_numbers = #tpu.dot_dimension_numbers<[1], [0], [0], [1], [0, 0, 1, 1], [], []>} : vector<2x16xbf16>, vector<16x16xbf16>, vector<2x16xf32> -> vector<2x16xf32>
    %7 = arith.addf %4, %6 : vector<2x16xf32>
    %c0_6 = arith.constant 0 : index
    %c0_7 = arith.constant 0 : index
    %8 = vector.load %arg8[%c0_6, %c0_7] : memref<2x16xf32, #tpu.memory_space<vmem>>, vector<2x16xf32>
    tpu.vector_store %arg8[%c0_6, %c0_7], %7 {strides = array<i32>} : memref<2x16xf32, #tpu.memory_space<vmem>>, vector<2x16xf32>,
    %c1_i32 = arith.constant 1 : i32
    %9 = arith.addi %arg0, %c1_i32 : i32
    %c2_i32 = arith.constant 2 : i32
    %10 = arith.muli %9, %c2_i32 : i32
    %c0_i32_8 = arith.constant 0 : i32
    %11 = arith.cmpi sgt, %10, %c0_i32_8 : i32
    %12 = arith.extui %11 : i1 to i32
    %c0_i32_9 = arith.constant 0 : i32
    %13 = arith.cmpi ne, %12, %c0_i32_9 : i32
    scf.if %13 {
      %c0_12 = arith.constant 0 : index
      %c0_13 = arith.constant 0 : index
      %17 = vector.load %arg9[%c0_12, %c0_13] : memref<2x4xf32, #tpu.memory_space<vmem>>, vector<2x4xf32>
      %c0_14 = arith.constant 0 : index
      %c0_15 = arith.constant 0 : index
      %18 = vector.load %arg5[%c0_14, %c0_15] : memref<16x4xbf16, #tpu.memory_space<vmem>>, vector<16x4xbf16>
      %cst_16 = arith.constant dense<0.000000e+00> : vector<2x4xf32>
      %19 = tpu.matmul %3, %18, %cst_16 {dimension_numbers = #tpu.dot_dimension_numbers<[1], [0], [0], [1], [0, 0, 1, 1], [], []>} : vector<2x16xbf16>, vector<16x4xbf16>, vector<2x4xf32> -> vector<2x4xf32>
      %20 = arith.addf %17, %19 : vector<2x4xf32>
      %c0_17 = arith.constant 0 : index
      %c0_18 = arith.constant 0 : index
      %21 = vector.load %arg9[%c0_17, %c0_18] : memref<2x4xf32, #tpu.memory_space<vmem>>, vector<2x4xf32>
      tpu.vector_store %arg9[%c0_17, %c0_18], %20 {strides = array<i32>} : memref<2x4xf32, #tpu.memory_space<vmem>>, vector<2x4xf32>,
    } else {
    }
    %c0_i32_10 = arith.constant 0 : i32
    %14 = arith.cmpi eq, %arg2, %c0_i32_10 : i32
    %15 = arith.extui %14 : i1 to i32
    %c0_i32_11 = arith.constant 0 : i32
    %16 = arith.cmpi ne, %15, %c0_i32_11 : i32
    scf.if %16 {
      %c0_12 = arith.constant 0 : index
      %c0_13 = arith.constant 0 : index
      %17 = vector.load %arg8[%c0_12, %c0_13] : memref<2x16xf32, #tpu.memory_space<vmem>>, vector<2x16xf32>
      %c0_14 = arith.constant 0 : index
      %c0_15 = arith.constant 0 : index
      %18 = vector.load %arg6[%c0_14, %c0_15] : memref<2x16xf32, #tpu.memory_space<vmem>>, vector<2x16xf32>
      tpu.vector_store %arg6[%c0_14, %c0_15], %17 {strides = array<i32>} : memref<2x16xf32, #tpu.memory_space<vmem>>, vector<2x16xf32>,
      %c0_16 = arith.constant 0 : index
      %c0_17 = arith.constant 0 : index
      %19 = vector.load %arg9[%c0_16, %c0_17] : memref<2x4xf32, #tpu.memory_space<vmem>>, vector<2x4xf32>
      %c0_18 = arith.constant 0 : index
      %c0_19 = arith.constant 0 : index
      %20 = vector.load %arg7[%c0_18, %c0_19] : memref<2x4xf32, #tpu.memory_space<vmem>>, vector<2x4xf32>
      tpu.vector_store %arg7[%c0_18, %c0_19], %19 {strides = array<i32>} : memref<2x4xf32, #tpu.memory_space<vmem>>, vector<2x4xf32>,
    } else {
    }
    return
  }
  func.func @transform_0(%arg0: i32, %arg1: i32, %arg2: i32) -> (i32, i32) {
    %c0_i32 = arith.constant 0 : i32
    return %arg0, %arg2 : i32, i32
  }
  func.func @transform_1(%arg0: i32, %arg1: i32, %arg2: i32) -> (i32, i32) {
    %c0_i32 = arith.constant 0 : i32
    return %arg2, %arg1 : i32, i32
  }
  func.func @transform_2(%arg0: i32, %arg1: i32, %arg2: i32) -> (i32, i32) {
    %c0_i32 = arith.constant 0 : i32
    return %arg2, %arg1 : i32, i32
  }
  func.func @transform_3(%arg0: i32, %arg1: i32, %arg2: i32) -> (i32, i32) {
    %c0_i32 = arith.constant 0 : i32
    return %arg0, %arg1 : i32, i32
  }
  func.func @transform_4(%arg0: i32, %arg1: i32, %arg2: i32) -> (i32, i32) {
    %c0_i32 = arith.constant 0 : i32
    return %arg0, %arg1 : i32, i32
  }
}

</mosaic_0001>

<bundles_post_ra>
// kernel: _wavelet_forward.5
= control target key start
LH: loop header
LB: loop body
LE: loop exit
PB: predicated region body
PF: predicated region fallthrough
CT: control target
= control target key end

     0   :  { %vm21_vm0 = vcmask 123904   ;;  %v180_v0 = vmov 0.0   ;;  %vm181_vm1 = vmmov 0   ;;  %vm35_vm2 = vcmask 130048   ;;  %s228_s1 = inlined_call_operand.vmem [shape: bf16[16,16], index: 1, kind: input, shape index: {}]   ;;  %s229_s2 = inlined_call_operand.vmem [shape: bf16[16,4], index: 2, kind: input, shape index: {}]   ;;  %s230_s0 = inlined_call_operand.vmem [shape: bf16[2,16], index: 0, kind: input, shape index: {}]   ;;  %s231_s3 = inlined_call_operand.vmem [shape: f32[2,16], index: 3, kind: output, shape index: {0}]   ;;  %s232_s4 = inlined_call_operand.vmem [shape: f32[2,4], index: 4, kind: output, shape index: {1}]  }
   0x1   :  { %164 = vmatprep.subr.bf16.mxu0 %v180_v0  ;;  %170 = vmatprep.subr.bf16.mxu1 %v180_v0  ;;  %v178_v1 = vld [vmem:[%s228_s1] sm:$0xff]   ;;  %22 = vst.msk [vmem:[#allocation2] sm:$0x3] %vm21_vm0, %v180_v0  ;;  %vm23_vm3 = vcmask 25600  }
   0x2   :  { %v179_v2 = vld [vmem:[%s229_s2] sm:$0xff]   ;;  %166 = vmatprep.mubr.msk.bf16.mxu0 %vm181_vm1, %v180_v0  ;;  %172 = vmatprep.mubr.msk.bf16.mxu1 %vm181_vm1, %v180_v0  ;;  %24 = vst.msk [vmem:[#allocation3] sm:$0x3] %vm23_vm3, %v180_v0 }
   0x3   :  { %165 = vmatpush3.bf16.msra.mxu0 %v178_v1  ;;  %v25_v3 = vld [vmem:[%s230_s0] sm:$0x1]  ;;  %171 = vmatpush3.bf16.msra.mxu1 %v179_v2 }
   0x6   :  { %167 = vmatmul.mubr.msk.bf16.vlgmr.msra.gmra.mrb[0].mxu0 %vm35_vm2, %v25_v3  ;;  %173 = vmatmul.mubr.msk.bf16.vlgmr.msra.gmra.mrb[0].mxu1 %vm35_vm2, %v25_v3 }
   0x8   :  { %v26_v4 = vld [vmem:[#allocation2] sm:$0x3] }
   0x9   :  { %v88_v5 = vld [vmem:[#allocation3] sm:$0x3] }
  0xd9   :  { %v73_v6 = vpop.f32.mrb[0].mxu0  ;;  %v131_v8 = vpop.f32.mrb[0].mxu1 }
  0xda   :  { %v79_v7 = vadd.f32 %v73_v6, %v26_v4  ;;  %v168_v9 = vpop.f32.mrb[1].mxu0  ;;  %v137_v10 = vadd.f32 %v131_v8, %v88_v5  ;;  %v174_v11 = vpop.f32.mrb[1].mxu1 }
  0xdb   :  { %v76_v12 = vpop.f32.mrb[2].mxu0  ;;  %v134_v13 = vpop.f32.mrb[2].mxu1 }
  0xdc   :  { %81 = vst.msk [vmem:[#allocation2] sm:$0x3] %vm21_vm0, %v79_v7  ;;  %v169_v14 = vpop.f32.mrb[3].mxu0  ;;  %v175_v15 = vpop.f32.mrb[3].mxu1 }
  0xdd   :  { %139 = vst.msk [vmem:[#allocation3] sm:$0x3] %vm23_vm3, %v137_v10 }
  0xe3   :  { %v143_v16 = vld [vmem:[#allocation2] sm:$0x3] }
  0xe4   :  { %144 = vst.msk [vmem:[%s231_s3] sm:$0x3] %vm21_vm0, %v143_v16  ;;  %v145_v17 = vld [vmem:[#allocation3] sm:$0x3] }
  0xe5   :  { %147 = vst.msk [vmem:[%s232_s4] sm:$0x3] %vm23_vm3, %v145_v17 }

// kernel: _wavelet_forward.4
= control target key start
LH: loop header
LB: loop body
LE: loop exit
PB: predicated region body
PF: predicated region fallthrough
CT: control target
= control target key end

     0   :  { %vm21_vm0 = vcmask 519168   ;;  %v258_v0 = vmov 0.0   ;;  %vm259_vm1 = vmmov 0   ;;  %vm59_vm2 = vcmask 523264   ;;  %s324_s1 = inlined_call_operand.vmem [shape: bf16[64,64], index: 1, kind: input, shape index: {}]   ;;  %s325_s2 = inlined_call_operand.vmem [shape: bf16[64,16], index: 2, kind: input, shape index: {}]   ;;  %s326_s0 = inlined_call_operand.vmem [shape: bf16[4,64], index: 0, kind: input, shape index: {}]   ;;  %s327_s3 = inlined_call_operand.vmem [shape: f32[4,64], index: 3, kind: output, shape index: {0}]   ;;  %s328_s4 = inlined_call_operand.vmem [shape: f32[4,16], index: 4, kind: output, shape index: {1}]  }
   0x1   :  { %224 = vmatprep.subr.bf16.mxu0 %v258_v0  ;;  %236 = vmatprep.subr.bf16.mxu1 %v258_v0  ;;  %v250_v1 = vld [vmem:[%s324_s1] sm:$0xff]   ;;  %22 = vst.msk [vmem:[#allocation2] sm:$0xf] %vm21_vm0, %v258_v0  ;;  %v252_v3 = vld [vmem:[%s324_s1 + $0x8] sm:$0xff]   ;;  %v254_v5 = vld [vmem:[%s324_s1 + $0x10] sm:$0xff]   ;;  %vm23_vm3 = vcmask 125952  }
   0x2   :  { %v251_v2 = vld [vmem:[%s325_s2] sm:$0xff]   ;;  %232 = vmatprep.mubr.msk.bf16.mxu0 %vm259_vm1, %v258_v0  ;;  %244 = vmatprep.mubr.msk.bf16.mxu1 %vm259_vm1, %v258_v0  ;;  %v253_v4 = vld [vmem:[%s325_s2 + $0x8] sm:$0xff]   ;;  %v255_v6 = vld [vmem:[%s325_s2 + $0x10] sm:$0xff]   ;;  %24 = vst.msk [vmem:[#allocation3] sm:$0xf] %vm23_vm3, %v258_v0 }
   0x3   :  { %225 = vmatpush3.bf16.msra.mxu0 %v250_v1  ;;  %237 = vmatpush3.bf16.msra.mxu1 %v251_v2  ;;  %v256_v7 = vld [vmem:[%s324_s1 + $0x18] sm:$0xff]   ;;  %v25_v9 = vld [vmem:[%s326_s0] sm:$0x3] }
   0x4   :  { %226 = vmatprep.subr.bf16.mxu0 %v258_v0  ;;  %238 = vmatprep.subr.bf16.mxu1 %v258_v0  ;;  %v257_v8 = vld [vmem:[%s325_s2 + $0x18] sm:$0xff]  }
   0x7   :  { %227 = vmatpush3.bf16.msra.mxu0 %v252_v3  ;;  %239 = vmatpush3.bf16.msra.mxu1 %v253_v4 }
   0x8   :  { %228 = vmatprep.subr.bf16.mxu0 %v258_v0  ;;  %240 = vmatprep.subr.bf16.mxu1 %v258_v0  ;;  %v26_v10 = vld [vmem:[#allocation2] sm:$0xf] }
   0x9   :  { %v112_v11 = vld [vmem:[#allocation3] sm:$0xf] }
   0xb   :  { %229 = vmatpush3.bf16.msra.mxu0 %v254_v5  ;;  %241 = vmatpush3.bf16.msra.mxu1 %v255_v6 }
   0xc   :  { %230 = vmatprep.subr.bf16.mxu0 %v258_v0  ;;  %242 = vmatprep.subr.bf16.mxu1 %v258_v0 }
   0xf   :  { %231 = vmatpush3.bf16.msra.mxu0 %v256_v7  ;;  %243 = vmatpush3.bf16.msra.mxu1 %v257_v8 }
  0x12   :  { %233 = vmatmul.mubr.msk.bf16.vlgmr.msra.gmra.mrb[0].mxu0 %vm59_vm2, %v25_v9  ;;  %245 = vmatmul.mubr.msk.bf16.vlgmr.msra.gmra.mrb[0].mxu1 %vm59_vm2, %v25_v9 }
  0xe5   :  { %v97_v12 = vpop.f32.mrb[0].mxu0  ;;  %v179_v14 = vpop.f32.mrb[0].mxu1 }
  0xe6   :  { %v103_v13 = vadd.f32 %v97_v12, %v26_v10  ;;  %v234_v15 = vpop.f32.mrb[1].mxu0  ;;  %v185_v16 = vadd.f32 %v179_v14, %v112_v11  ;;  %v246_v17 = vpop.f32.mrb[1].mxu1 }
  0xe7   :  { %v100_v18 = vpop.f32.mrb[2].mxu0  ;;  %v182_v19 = vpop.f32.mrb[2].mxu1 }
  0xe8   :  { %105 = vst.msk [vmem:[#allocation2] sm:$0xf] %vm21_vm0, %v103_v13  ;;  %v235_v20 = vpop.f32.mrb[3].mxu0  ;;  %v247_v21 = vpop.f32.mrb[3].mxu1 }
  0xe9   :  { %187 = vst.msk [vmem:[#allocation3] sm:$0xf] %vm23_vm3, %v185_v16 }
  0xef   :  { %v191_v22 = vld [vmem:[#allocation2] sm:$0xf] }
  0xf0   :  { %192 = vst.msk [vmem:[%s327_s3] sm:$0xf] %vm21_vm0, %v191_v22  ;;  %v193_v23 = vld [vmem:[#allocation3] sm:$0xf] }
  0xf1   :  { %195 = vst.msk [vmem:[%s328_s4] sm:$0xf] %vm23_vm3, %v193_v23 }

// kernel: _wavelet_forward.3
= control target key start
LH: loop header
LB: loop body
LE: loop exit
PB: predicated region body
PF: predicated region fallthrough
CT: control target
= control target key end

     0   :  { %vm23_vm0 = vcmask 523264   ;;  %v607_v51 = vmov 0.0   ;;  %s789_s1 = inlined_call_operand.vmem [shape: bf16[256,256], index: 1, kind: input, shape index: {}]   ;;  %s790_s2 = inlined_call_operand.vmem [shape: bf16[256,64], index: 2, kind: input, shape index: {}]   ;;  %s791_s0 = inlined_call_operand.vmem [shape: bf16[8,256], index: 0, kind: input, shape index: {}]   ;;  %s792_s4 = inlined_call_operand.vmem [shape: f32[8,64], index: 4, kind: output, shape index: {1}]   ;;  %s793_s3 = inlined_call_operand.vmem [shape: f32[8,256], index: 3, kind: output, shape index: {0}]  }
   0x1   :  { %v541_v0 = vld [vmem:[%s789_s1 + $0x4] ss:$8 sps:$4 sm:$0xff]   ;;  %v543_v1 = vld [vmem:[%s789_s1] ss:$8 sps:$4 sm:$0xff]   ;;  %v544_v2 = vld [vmem:[%s789_s1 + $0x14] ss:$8 sps:$4 sm:$0xff]  }
   0x2   :  { %227 = vmatprep.subr.bf16.mxu0 %v541_v0  ;;  %v546_v3 = vld [vmem:[%s789_s1 + $0x10] ss:$8 sps:$4 sm:$0xff]   ;;  %v547_v4 = vld [vmem:[%s789_s1 + $0x24] ss:$8 sps:$4 sm:$0xff]   ;;  %v549_v5 = vld [vmem:[%s789_s1 + $0x20] ss:$8 sps:$4 sm:$0xff]  }
   0x3   :  { %228 = vmatpush1.bf16.msra.mxu0 %v543_v1  ;;  %v550_v6 = vld [vmem:[%s789_s1 + $0x34] ss:$8 sps:$4 sm:$0xff]   ;;  %v556_v7 = vld [vmem:[%s790_s2 + $0x40] sm:$0xff]   ;;  %v552_v9 = vld [vmem:[%s789_s1 + $0x30] ss:$8 sps:$4 sm:$0xff]   ;;  %24 = vst.msk [vmem:[#allocation3] sm:$0xff] %vm23_vm0, %v607_v51 }
   0x4   :  { %229 = vmatprep.subr.bf16.mxu0 %v544_v2  ;;  %v557_v8 = vld [vmem:[%s790_s2] sm:$0xff]   ;;  %518 = vmatprep.subr.bf16.mxu1 %v556_v7  ;;  %v561_v10 = vld [vmem:[%s790_s2 + $0x48] sm:$0xff]   ;;  %v566_v14 = vld [vmem:[%s790_s2 + $0x50] sm:$0xff]  }
   0x5   :  { %519 = vmatpush3.bf16.msra.mxu1 %v557_v8  ;;  %v562_v11 = vld [vmem:[%s790_s2 + $0x8] sm:$0xff]   ;;  %v567_v15 = vld [vmem:[%s790_s2 + $0x10] sm:$0xff]   ;;  %v571_v17 = vld [vmem:[%s790_s2 + $0x58] sm:$0xff]  }
   0x6   :  { %v553_v12 = vld [vmem:[%s789_s1 + $0x44] ss:$8 sps:$4 sm:$0xff]   ;;  %520 = vmatprep.subr.bf16.mxu1 %v561_v10  ;;  %v555_v13 = vld [vmem:[%s789_s1 + $0x40] ss:$8 sps:$4 sm:$0xff]   ;;  %v558_v16 = vld [vmem:[%s789_s1 + $0x54] ss:$8 sps:$4 sm:$0xff]  }
   0x7   :  { %230 = vmatpush1.bf16.msra.mxu0 %v546_v3  ;;  %v572_v18 = vld [vmem:[%s790_s2 + $0x18] sm:$0xff]   ;;  %v563_v20 = vld [vmem:[%s789_s1 + $0x64] ss:$8 sps:$4 sm:$0xff]   ;;  %v565_v22 = vld [vmem:[%s789_s1 + $0x60] ss:$8 sps:$4 sm:$0xff]  }
   0x8   :  { %231 = vmatprep.subr.bf16.mxu0 %v547_v4  ;;  %v560_v19 = vld [vmem:[%s789_s1 + $0x50] ss:$8 sps:$4 sm:$0xff]   ;;  %v576_v21 = vld [vmem:[%s790_s2 + $0x60] sm:$0xff]   ;;  %v568_v24 = vld [vmem:[%s789_s1 + $0x74] ss:$8 sps:$4 sm:$0xff]  }
   0x9   :  { %521 = vmatpush3.bf16.msra.mxu1 %v562_v11  ;;  %v577_v23 = vld [vmem:[%s790_s2 + $0x20] sm:$0xff]   ;;  %v581_v25 = vld [vmem:[%s790_s2 + $0x68] sm:$0xff]   ;;  %v570_v26 = vld [vmem:[%s789_s1 + $0x70] ss:$8 sps:$4 sm:$0xff]  }
   0xa   :  { %522 = vmatprep.subr.bf16.mxu1 %v566_v14  ;;  %v582_v27 = vld [vmem:[%s790_s2 + $0x28] sm:$0xff]   ;;  %v586_v28 = vld [vmem:[%s790_s2 + $0x70] sm:$0xff]   ;;  %v591_v32 = vld [vmem:[%s790_s2 + $0x78] sm:$0xff]  }
   0xb   :  { %232 = vmatpush1.bf16.msra.mxu0 %v549_v5  ;;  %v573_v29 = vld [vmem:[%s789_s1 + $0x84] ss:$8 sps:$4 sm:$0xff]   ;;  %v575_v30 = vld [vmem:[%s789_s1 + $0x80] ss:$8 sps:$4 sm:$0xff]   ;;  %v587_v31 = vld [vmem:[%s790_s2 + $0x30] sm:$0xff]  }
   0xc   :  { %233 = vmatprep.subr.bf16.mxu0 %v550_v6  ;;  %v578_v33 = vld [vmem:[%s789_s1 + $0x94] ss:$8 sps:$4 sm:$0xff]   ;;  %v25_v34 = vld [vmem:[%s791_s0] sm:$0xff]  ;;  %v580_v37 = vld [vmem:[%s789_s1 + $0x90] ss:$8 sps:$4 sm:$0xff]  }
   0xd   :  { %523 = vmatpush3.bf16.msra.mxu1 %v567_v15  ;;  %v592_v35 = vld [vmem:[%s790_s2 + $0x38] sm:$0xff]   ;;  %v469_v36 = vcombine.high %v25_v34, %v25_v34  ;;  %v583_v38 = vld [vmem:[%s789_s1 + $0xa4] ss:$8 sps:$4 sm:$0xff]   ;;  %v468_v39 = vcombine.low %v25_v34, %v25_v34  ;;  %v585_v40 = vld [vmem:[%s789_s1 + $0xa0] ss:$8 sps:$4 sm:$0xff]  }
   0xe   :  { %524 = vmatprep.subr.bf16.mxu1 %v571_v17  ;;  %v588_v41 = vld [vmem:[%s789_s1 + $0xb4] ss:$8 sps:$4 sm:$0xff]   ;;  %v590_v42 = vld [vmem:[%s789_s1 + $0xb0] ss:$8 sps:$4 sm:$0xff]   ;;  %v593_v43 = vld [vmem:[%s789_s1 + $0xc4] ss:$8 sps:$4 sm:$0xff]  }
   0xf   :  { %234 = vmatpush1.bf16.msra.mxu0 %v552_v9  ;;  %439 = vmatprep.mubr.bf16.mxu1 %v469_v36  ;;  %v595_v44 = vld [vmem:[%s789_s1 + $0xc0] ss:$8 sps:$4 sm:$0xff]   ;;  %v598_v45 = vld [vmem:[%s789_s1 + $0xd4] ss:$8 sps:$4 sm:$0xff]   ;;  %v600_v46 = vld [vmem:[%s789_s1 + $0xd0] ss:$8 sps:$4 sm:$0xff]  }
  0x10   :  { %235 = vmatprep.subr.bf16.mxu0 %v553_v12  ;;  %259 = vmatprep.mubr.bf16.mxu0 %v469_v36  ;;  %v601_v47 = vld [vmem:[%s789_s1 + $0xe4] ss:$8 sps:$4 sm:$0xff]   ;;  %v603_v48 = vld [vmem:[%s789_s1 + $0xe0] ss:$8 sps:$4 sm:$0xff]   ;;  %v604_v49 = vld [vmem:[%s789_s1 + $0xf4] ss:$8 sps:$4 sm:$0xff]  }
  0x11   :  { %525 = vmatpush3.bf16.msra.mxu1 %v572_v18  ;;  %v606_v50 = vld [vmem:[%s789_s1 + $0xf0] ss:$8 sps:$4 sm:$0xff]   ;;  %v278_v53 = vld [vmem:[#allocation3] sm:$0xff] }
  0x12   :  { %526 = vmatprep.subr.bf16.mxu1 %v576_v21 }
  0x13   :  { %236 = vmatpush1.bf16.msra.mxu0 %v555_v13 }
  0x14   :  { %237 = vmatprep.subr.bf16.mxu0 %v558_v16 }
  0x15   :  { %527 = vmatpush3.bf16.msra.mxu1 %v577_v23 }
  0x16   :  { %528 = vmatprep.subr.bf16.mxu1 %v581_v25 }
  0x17   :  { %238 = vmatpush1.bf16.msra.mxu0 %v560_v19 }
  0x18   :  { %239 = vmatprep.subr.bf16.mxu0 %v563_v20 }
  0x19   :  { %529 = vmatpush3.bf16.msra.mxu1 %v582_v27 }
  0x1a   :  { %530 = vmatprep.subr.bf16.mxu1 %v586_v28 }
  0x1b   :  { %240 = vmatpush1.bf16.msra.mxu0 %v565_v22 }
  0x1c   :  { %241 = vmatprep.subr.bf16.mxu0 %v568_v24 }
  0x1d   :  { %531 = vmatpush3.bf16.msra.mxu1 %v587_v31 }
  0x1e   :  { %532 = vmatprep.subr.bf16.mxu1 %v591_v32 }
  0x1f   :  { %242 = vmatpush1.bf16.msra.mxu0 %v570_v26 }
  0x20   :  { %243 = vmatprep.subr.bf16.mxu0 %v573_v29 }
  0x21   :  { %533 = vmatpush3.bf16.msra.mxu1 %v592_v35 }
  0x23   :  { %244 = vmatpush1.bf16.msra.mxu0 %v575_v30 }
  0x24   :  { %245 = vmatprep.subr.bf16.mxu0 %v578_v33  ;;  %440 = vmatmul.mubr.bf16.vlgmr.msra.gmra.mrb[0].mxu1 %v468_v39 }
  0x27   :  { %246 = vmatpush1.bf16.msra.mxu0 %v580_v37 }
  0x28   :  { %247 = vmatprep.subr.bf16.mxu0 %v583_v38 }
  0x2b   :  { %248 = vmatpush1.bf16.msra.mxu0 %v585_v40 }
  0x2c   :  { %249 = vmatprep.subr.bf16.mxu0 %v588_v41 }
  0x2f   :  { %250 = vmatpush1.bf16.msra.mxu0 %v590_v42 }
  0x30   :  { %251 = vmatprep.subr.bf16.mxu0 %v593_v43 }
  0x33   :  { %252 = vmatpush1.bf16.msra.mxu0 %v595_v44 }
  0x34   :  { %253 = vmatprep.subr.bf16.mxu0 %v598_v45 }
  0x37   :  { %254 = vmatpush1.bf16.msra.mxu0 %v600_v46 }
  0x38   :  { %255 = vmatprep.subr.bf16.mxu0 %v601_v47 }
  0x3b   :  { %256 = vmatpush1.bf16.msra.mxu0 %v603_v48 }
  0x3c   :  { %257 = vmatprep.subr.bf16.mxu0 %v604_v49 }
  0x3f   :  { %258 = vmatpush1.bf16.msra.mxu0 %v606_v50 }
  0x42   :  { %260 = vmatmul.mubr.bf16.vlgmr.msra.gmra.mrb[0].mxu0 %v468_v39 }
  0xf7   :  { %v534_v52 = vpop.f32.mrb[0].mxu1 }
  0xf8   :  { %v535_v54 = vpop.f32.mrb[1].mxu1 }
  0xf9   :  { %v536_v55 = vadd.f32 %v535_v54, %v534_v52  ;;  %v537_v56 = vpop.f32.mrb[2].mxu1 }
  0xfa   :  { %v538_v57 = vpop.f32.mrb[3].mxu1 }
  0xfb   :  { %v447_v58 = vadd.f32 %v536_v55, %v278_v53 }
  0xfd   :  { %449 = vst.msk [vmem:[#allocation3] sm:$0xff] %vm23_vm0, %v447_v58 }
 0x104   :  { %v457_v59 = vld [vmem:[#allocation3] sm:$0xff] }
 0x105   :  { %459 = vst.msk [vmem:[%s792_s4] sm:$0xff] %vm23_vm0, %v457_v59 }
 0x115   :  { %v261_v60 = vpop.f32.mrb[0].mxu0 }
 0x116   :  { %455 = vst [vmem:[%s793_s3] sm:$0xff] %v261_v60  ;;  %v263_v61 = vpop.f32.mrb[1].mxu0 }
 0x117   :  { %456 = vst [vmem:[%s793_s3 + $0x8] sm:$0xff] %v263_v61  ;;  %v265_v62 = vpop.f32.mrb[2].mxu0 }
 0x118   :  { %v266_v63 = vpop.f32.mrb[3].mxu0 }

</bundles_post_ra>
